<compile_context>
chip_gen: v6e
topology: v6e:2x2x1
jax: 0.10.0
libtpu: 0.0.40
codegen_flags: <defaults>
</compile_context>

<pallas_src>
import math

import jax
import jax.numpy as jnp
from jax.experimental import pallas as pl
from jax.experimental.pallas import tpu as pltpu


# ------------------------------ helpers -------------------------------------

def _round_up(a: int, b: int) -> int:
    return (a + b - 1) // b * b


def _next_pow2(v: int) -> int:
    return 1 << (max(1, v) - 1).bit_length()


def _vmem_capacity_bytes() -> int:
    try:
        return int(pltpu.get_tpu_info().vmem_capacity_bytes)
    except Exception:
        return 64 * 1024 * 1024  # v7x per-TensorCore VMEM: smallest current gen


def _choose_tiling(N, rhs_cols, acc_cols, out_cols, w_bytes, item, sublane, budget):
    """Pick power-of-two (tm, tk) row / contraction tiles that fit `budget` bytes."""

    def footprint(tm, tk):
        b = 2 * tm * tk * item            # adj tile (double buffered)
        b += 2 * tk * rhs_cols * item     # x / h contraction tile (double buffered)
        b += 2 * tm * out_cols * 4        # f32 output tile (double buffered)
        b += 2 * w_bytes                  # resident W^T block (default 2 buffers)
        b += 2 * out_cols * 4             # bias row
        b += tm * acc_cols * 4            # f32 accumulator scratch
        return b

    tm = max(sublane, min(512, _next_pow2(_round_up(N, sublane))))
    tk = max(128, min(2048, _next_pow2(_round_up(N, 128))))
    while footprint(tm, tk) > budget and tk > 128:
        tk //= 2
    while footprint(tm, tk) > budget and tm > sublane:
        tm //= 2
    # Give v7x's two TensorCores several row tiles each (harmless on v5e/v6e).
    while tm > sublane and _round_up(N, tm) // tm < 4:
        tm //= 2
    return tm, tk


# ------------------------------ kernels -------------------------------------

def _gcn_kernel_adj_x(adj_ref, x_ref, wt_ref, bias_ref, alpha_ref, o_ref, acc_ref):
    """F_in <= F_out path: out = PReLU(((adj @ x) @ W^T) + bias), K-tiled adj@x."""
    k = pl.program_id(1)

    @pl.when(k == 0)
    def _():
        acc_ref[...] = jnp.zeros_like(acc_ref)

    acc_ref[...] += jnp.dot(adj_ref[...], x_ref[...],
                            preferred_element_type=jnp.float32)

    @pl.when(k == pl.num_programs(1) - 1)
    def _():
        # Epilogue in f32: no bf16 re-rounding of the accumulator (small matmul).
        seq = jnp.dot(acc_ref[...], wt_ref[...].astype(jnp.float32),
                      preferred_element_type=jnp.float32)
        seq = seq + bias_ref[...]
        alpha = alpha_ref[0]
        o_ref[...] = jnp.where(seq >= 0.0, seq, alpha * seq).astype(o_ref.dtype)


def _gcn_kernel_adj_h(adj_ref, h_ref, bias_ref, alpha_ref, o_ref, acc_ref):
    """F_in > F_out path: out = PReLU((adj @ h) + bias), h = x @ W^T precomputed."""
    k = pl.program_id(1)

    @pl.when(k == 0)
    def _():
        acc_ref[...] = jnp.zeros_like(acc_ref)

    acc_ref[...] += jnp.dot(adj_ref[...], h_ref[...],
                            preferred_element_type=jnp.float32)

    @pl.when(k == pl.num_programs(1) - 1)
    def _():
        seq = acc_ref[...] + bias_ref[...]
        alpha = alpha_ref[0]
        o_ref[...] = jnp.where(seq >= 0.0, seq, alpha * seq).astype(o_ref.dtype)


# ------------------------------ wrapper -------------------------------------

def graph_convolution(x, adj, weight, bias, alpha, *, matmul_dtype=jnp.bfloat16):
    """GraphConvolution forward.

    x: [N, F_in], adj: [N, N] dense (or pre-padded [n_rows_pad, n_cols_pad] in
    `matmul_dtype`), weight: [F_out, F_in] (torch Linear layout), bias: [F_out],
    alpha: scalar PReLU slope.  Returns f32 [N, F_out].
    """
    N, F_in = x.shape
    F_out = weight.shape[0]
    md = jnp.dtype(matmul_dtype)
    item = md.itemsize
    sublane = max(8, 32 // item)          # 8 for f32, 16 for bf16, 32 for 8-bit

    f_in_pad = _round_up(F_in, 128)
    f_out_pad = _round_up(F_out, 128)

    use_adj_x_first = F_in <= F_out       # associativity: keep the N^2 term narrow
    rhs_cols = f_in_pad if use_adj_x_first else f_out_pad
    acc_cols = rhs_cols
    w_bytes = f_in_pad * f_out_pad * item if use_adj_x_first else 0

    vmem_cap = _vmem_capacity_bytes()
    tm, tk = _choose_tiling(N, rhs_cols, acc_cols, f_out_pad, w_bytes, item,
                            sublane, budget=int(0.45 * vmem_cap))
    n_rows_pad = _round_up(N, tm)
    n_cols_pad = _round_up(N, tk)

    # Skip the O(N^2) pad/cast if the caller already supplies a prepared adj.
    if adj.shape == (n_rows_pad, n_cols_pad) and adj.dtype == md:
        adj_p = adj
    else:
        adj_p = jnp.zeros((n_rows_pad, n_cols_pad), md).at[:N, :N].set(adj.astype(md))

    bias_p = jnp.zeros((1, f_out_pad), jnp.float32).at[0, :F_out].set(
        bias.astype(jnp.float32))
    alpha_arr = jnp.full((1,), alpha, jnp.float32)
    w_t = weight.T.astype(md)             # one-time transpose: [F_in, F_out]

    if use_adj_x_first:
        x_p = jnp.zeros((n_cols_pad, f_in_pad), md).at[:N, :F_in].set(x.astype(md))
        wt_p = jnp.zeros((f_in_pad, f_out_pad), md).at[:F_in, :F_out].set(w_t)
        kernel = _gcn_kernel_adj_x
        operands = (adj_p, x_p, wt_p, bias_p, alpha_arr)
        in_specs = [
            pl.BlockSpec((tm, tk), lambda i, k: (i, k)),               # adj tile
            pl.BlockSpec((tk, f_in_pad), lambda i, k: (k, 0)),         # x K-tile
            pl.BlockSpec((f_in_pad, f_out_pad), lambda i, k: (0, 0)),  # W^T (invariant)
            pl.BlockSpec((1, f_out_pad), lambda i, k: (0, 0)),         # bias (invariant)
            pl.BlockSpec(memory_space=pltpu.SMEM),                     # alpha scalar
        ]
        flops = (2 * n_rows_pad * n_cols_pad * f_in_pad
                 + 2 * n_rows_pad * f_in_pad * f_out_pad)
    else:
        # Hoisted feature transform: computed once here, streamed by the kernel.
        h = jnp.dot(x.astype(md), w_t, preferred_element_type=jnp.float32)
        h_p = jnp.zeros((n_cols_pad, f_out_pad), md).at[:N, :F_out].set(h.astype(md))
        kernel = _gcn_kernel_adj_h
        operands = (adj_p, h_p, bias_p, alpha_arr)
        in_specs = [
            pl.BlockSpec((tm, tk), lambda i, k: (i, k)),               # adj tile
            pl.BlockSpec((tk, f_out_pad), lambda i, k: (k, 0)),        # h K-tile
            pl.BlockSpec((1, f_out_pad), lambda i, k: (0, 0)),         # bias (invariant)
            pl.BlockSpec(memory_space=pltpu.SMEM),                     # alpha scalar
        ]
        flops = 2 * n_rows_pad * n_cols_pad * f_out_pad

    grid = (n_rows_pad // tm, n_cols_pad // tk)
    bytes_accessed = (adj_p.size * item
                      + grid[0] * n_cols_pad * rhs_cols * item  # rhs re-read per row tile
                      + w_bytes
                      + f_out_pad * 4
                      + n_rows_pad * f_out_pad * 4)

    out = pl.pallas_call(
        kernel,
        out_shape=jax.ShapeDtypeStruct((n_rows_pad, f_out_pad), jnp.float32),
        grid=grid,
        in_specs=in_specs,
        out_specs=pl.BlockSpec((tm, f_out_pad), lambda i, k: (i, 0)),
        scratch_shapes=[pltpu.VMEM((tm, acc_cols), jnp.float32)],
        compiler_params=pltpu.CompilerParams(
            dimension_semantics=("parallel", "arbitrary"),
            vmem_limit_bytes=int(min(0.85 * vmem_cap, 100 * 1024 * 1024))),
        cost_estimate=pl.CostEstimate(
            flops=flops, transcendentals=0, bytes_accessed=bytes_accessed),
    )(*operands)

    return out[:N, :F_out]


# ------------------------------ references ----------------------------------

def _reference_f32(x, adj, weight, bias, alpha):
    """Module semantics in pure f32 (the PyTorch forward)."""
    h = x @ weight.T
    seq = adj @ h + bias
    return jnp.where(seq >= 0.0, seq, alpha * seq)


def _reference_kernel_path(x, adj, weight, bias, alpha, matmul_dtype):
    """Emulates the kernel's exact numerics (operand dtypes + matmul order)."""
    md = jnp.dtype(matmul_dtype)
    xd, ad, wtd = x.astype(md), adj.astype(md), weight.T.astype(md)
    if x.shape[1] <= weight.shape[0]:
        tmp = jnp.dot(ad, xd, preferred_element_type=jnp.float32)
        seq = jnp.dot(tmp, wtd.astype(jnp.float32),
                      preferred_element_type=jnp.float32)
    else:
        h = jnp.dot(xd, wtd, preferred_element_type=jnp.float32)
        seq = jnp.dot(ad, h.astype(md), preferred_element_type=jnp.float32)
    seq = seq + bias
    return jnp.where(seq >= 0.0, seq, alpha * seq)


if __name__ == "__main__":
    alpha = 0.25  # torch.nn.PReLU default

    # ---- Case 1: module-sized demo, bf16 operands, F_in <= F_out path ------
    N, F_in, F_out = 16, 32, 64
    k_x, k_adj, k_w = jax.random.split(jax.random.PRNGKey(0), 3)
    x = jax.random.normal(k_x, (N, F_in), dtype=jnp.float32)
    adj = jax.random.uniform(k_adj, (N, N), dtype=jnp.float32)
    bound = math.sqrt(6.0 / (F_in + F_out))        # xavier_uniform_ for fc_1.weight
    weight = jax.random.uniform(k_w, (F_out, F_in), dtype=jnp.float32,
                                minval=-bound, maxval=bound)
    bias = jnp.zeros((F_out,), dtype=jnp.float32)  # bias_1 initialized to 0

    out = jax.block_until_ready(graph_convolution(x, adj, weight, bias, alpha))
    assert out.shape == (N, F_out)
    ref_exact = _reference_kernel_path(x, adj, weight, bias, alpha, jnp.bfloat16)
    assert jnp.allclose(out, ref_exact, atol=2e-3, rtol=2e-3), "mismatch vs kernel-path ref"
    ref_f32 = _reference_f32(x, adj, weight, bias, alpha)
    assert jnp.allclose(out, ref_f32, atol=1.5e-1, rtol=5e-2), "mismatch vs f32 ref"

    # ---- Case 2: f32 operands, odd shapes, F_in > F_out (hoisted-h path) ----
    N2, Fi2, Fo2 = 20, 48, 24
    k_x2, k_adj2, k_w2 = jax.random.split(jax.random.PRNGKey(1), 3)
    x2 = jax.random.normal(k_x2, (N2, Fi2), dtype=jnp.float32)
    adj2 = jax.random.uniform(k_adj2, (N2, N2), dtype=jnp.float32)
    b2 = math.sqrt(6.0 / (Fi2 + Fo2))
    w2 = jax.random.uniform(k_w2, (Fo2, Fi2), dtype=jnp.float32, minval=-b2, maxval=b2)
    bias2 = jnp.zeros((Fo2,), dtype=jnp.float32)

    out2 = jax.block_until_ready(
        graph_convolution(x2, adj2, w2, bias2, alpha, matmul_dtype=jnp.float32))
    assert out2.shape == (N2, Fo2)
    assert jnp.allclose(out2, _reference_f32(x2, adj2, w2, bias2, alpha),
                        atol=1e-3, rtol=1e-3), "mismatch vs f32 ref (case 2)"

    print("KERNEL_OK")
</pallas_src>

<mosaic_0001>
module attributes {stable_mosaic.version = 11 : i64} {
  func.func @_gcn_kernel_adj_x(%arg0: i32, %arg1: i32, %arg2: memref<16x128xbf16, #tpu.memory_space<vmem>>, %arg3: memref<128x128xbf16, #tpu.memory_space<vmem>>, %arg4: memref<128x128xbf16, #tpu.memory_space<vmem>>, %arg5: memref<1x128xf32, #tpu.memory_space<vmem>>, %arg6: memref<1xf32, #tpu.memory_space<smem>>, %arg7: memref<16x128xf32, #tpu.memory_space<vmem>>, %arg8: memref<16x128xf32, #tpu.memory_space<vmem>>) attributes {dimension_semantics = [#tpu.dimension_semantics<parallel>, #tpu.dimension_semantics<arbitrary>], iteration_bounds = array<i64: 1, 1>, scalar_prefetch = 0 : i64, scratch_operands = 1 : i64, tpu.core_type = #tpu.core_type<tc>, window_params = [{transform_indices = @transform_0, window_bounds = array<i64: 16, 128>}, {transform_indices = @transform_1, window_bounds = array<i64: 128, 128>}, {pipeline_mode = #tpu.pipeline_mode<synchronous>, transform_indices = @transform_2, window_bounds = array<i64: 128, 128>}, {pipeline_mode = #tpu.pipeline_mode<synchronous>, transform_indices = @transform_3, window_bounds = array<i64: 1, 128>}, {transform_indices = @transform_4, window_bounds = array<i64: 1>}, {transform_indices = @transform_5, window_bounds = array<i64: 16, 128>}]} {
    %c0_i32 = arith.constant 0 : i32
    %0 = arith.cmpi eq, %arg1, %c0_i32 : i32
    %1 = arith.extui %0 : i1 to i32
    %c0_i32_0 = arith.constant 0 : i32
    %2 = arith.cmpi ne, %1, %c0_i32_0 : i32
    scf.if %2 {
      %cst_10 = arith.constant 0.000000e+00 : f32
      %12 = vector.broadcast %cst_10 : f32 to vector<16x128xf32>
      %c0_11 = arith.constant 0 : index
      %c0_12 = arith.constant 0 : index
      %13 = vector.load %arg8[%c0_11, %c0_12] : memref<16x128xf32, #tpu.memory_space<vmem>>, vector<16x128xf32>
      tpu.vector_store %arg8[%c0_11, %c0_12], %12 {strides = array<i32>} : memref<16x128xf32, #tpu.memory_space<vmem>>, vector<16x128xf32>,
    } else {
    }
    %c0 = arith.constant 0 : index
    %c0_1 = arith.constant 0 : index
    %3 = vector.load %arg8[%c0, %c0_1] : memref<16x128xf32, #tpu.memory_space<vmem>>, vector<16x128xf32>
    %c0_2 = arith.constant 0 : index
    %c0_3 = arith.constant 0 : index
    %4 = vector.load %arg2[%c0_2, %c0_3] : memref<16x128xbf16, #tpu.memory_space<vmem>>, vector<16x128xbf16>
    %c0_4 = arith.constant 0 : index
    %c0_5 = arith.constant 0 : index
    %5 = vector.load %arg3[%c0_4, %c0_5] : memref<128x128xbf16, #tpu.memory_space<vmem>>, vector<128x128xbf16>
    %cst = arith.constant dense<0.000000e+00> : vector<16x128xf32>
    %6 = tpu.matmul %4, %5, %cst {dimension_numbers = #tpu.dot_dimension_numbers<[1], [0], [0], [1], [0, 0, 1, 1], [], []>} : vector<16x128xbf16>, vector<128x128xbf16>, vector<16x128xf32> -> vector<16x128xf32>
    %7 = arith.addf %3, %6 : vector<16x128xf32>
    %c0_6 = arith.constant 0 : index
    %c0_7 = arith.constant 0 : index
    %8 = vector.load %arg8[%c0_6, %c0_7] : memref<16x128xf32, #tpu.memory_space<vmem>>, vector<16x128xf32>
    tpu.vector_store %arg8[%c0_6, %c0_7], %7 {strides = array<i32>} : memref<16x128xf32, #tpu.memory_space<vmem>>, vector<16x128xf32>,
    %c0_i32_8 = arith.constant 0 : i32
    %9 = arith.cmpi eq, %arg1, %c0_i32_8 : i32
    %10 = arith.extui %9 : i1 to i32
    %c0_i32_9 = arith.constant 0 : i32
    %11 = arith.cmpi ne, %10, %c0_i32_9 : i32
    scf.if %11 {
      %c0_10 = arith.constant 0 : index
      %c0_11 = arith.constant 0 : index
      %12 = vector.load %arg8[%c0_10, %c0_11] : memref<16x128xf32, #tpu.memory_space<vmem>>, vector<16x128xf32>
      %c0_12 = arith.constant 0 : index
      %c0_13 = arith.constant 0 : index
      %13 = vector.load %arg4[%c0_12, %c0_13] : memref<128x128xbf16, #tpu.memory_space<vmem>>, vector<128x128xbf16>
      %14 = arith.extf %13 : vector<128x128xbf16> to vector<128x128xf32>
      %cst_14 = arith.constant dense<0.000000e+00> : vector<16x128xf32>
      %15 = tpu.matmul %12, %14, %cst_14 {dimension_numbers = #tpu.dot_dimension_numbers<[1], [0], [0], [1], [0, 0, 1, 1], [], []>} : vector<16x128xf32>, vector<128x128xf32>, vector<16x128xf32> -> vector<16x128xf32>
      %c0_15 = arith.constant 0 : index
      %c0_16 = arith.constant 0 : index
      %16 = vector.load %arg5[%c0_15, %c0_16] : memref<1x128xf32, #tpu.memory_space<vmem>>, vector<1x128xf32>
      %17 = vector.broadcast %16 : vector<1x128xf32> to vector<16x128xf32>
      %18 = arith.addf %15, %17 : vector<16x128xf32>
      %c0_17 = arith.constant 0 : index
      %19 = memref.load %arg6[%c0_17] : memref<1xf32, #tpu.memory_space<smem>>
      %cst_18 = arith.constant 0.000000e+00 : f32
      %20 = vector.broadcast %cst_18 : f32 to vector<16x128xf32>
      %21 = arith.cmpf oge, %18, %20 : vector<16x128xf32>
      %22 = vector.broadcast %19 : f32 to vector<16x128xf32>
      %23 = arith.mulf %22, %18 : vector<16x128xf32>
      %24 = arith.select %21, %18, %23 : vector<16x128xi1>, vector<16x128xf32>
      %c0_19 = arith.constant 0 : index
      %c0_20 = arith.constant 0 : index
      %25 = vector.load %arg7[%c0_19, %c0_20] : memref<16x128xf32, #tpu.memory_space<vmem>>, vector<16x128xf32>
      tpu.vector_store %arg7[%c0_19, %c0_20], %24 {strides = array<i32>} : memref<16x128xf32, #tpu.memory_space<vmem>>, vector<16x128xf32>,
    } else {
    }
    return
  }
  func.func @transform_0(%arg0: i32, %arg1: i32) -> (i32, i32) {
    %c0_i32 = arith.constant 0 : i32
    return %arg0, %arg1 : i32, i32
  }
  func.func @transform_1(%arg0: i32, %arg1: i32) -> (i32, i32) {
    %c0_i32 = arith.constant 0 : i32
    %c0_i32_0 = arith.constant 0 : i32
    return %arg1, %c0_i32 : i32, i32
  }
  func.func @transform_2(%arg0: i32, %arg1: i32) -> (i32, i32) {
    %c0_i32 = arith.constant 0 : i32
    %c0_i32_0 = arith.constant 0 : i32
    %c0_i32_1 = arith.constant 0 : i32
    return %c0_i32, %c0_i32_0 : i32, i32
  }
  func.func @transform_3(%arg0: i32, %arg1: i32) -> (i32, i32) {
    %c0_i32 = arith.constant 0 : i32
    %c0_i32_0 = arith.constant 0 : i32
    %c0_i32_1 = arith.constant 0 : i32
    return %c0_i32, %c0_i32_0 : i32, i32
  }
  func.func @transform_4(%arg0: i32, %arg1: i32) -> i32 {
    %c0_i32 = arith.constant 0 : i32
    %c0_i32_0 = arith.constant 0 : i32
    return %c0_i32 : i32
  }
  func.func @transform_5(%arg0: i32, %arg1: i32) -> (i32, i32) {
    %c0_i32 = arith.constant 0 : i32
    %c0_i32_0 = arith.constant 0 : i32
    return %arg0, %c0_i32 : i32, i32
  }
}

</mosaic_0001>

<bundles_post_ra>
// kernel: tpu_custom_call.1
= control target key start
LH: loop header
LB: loop body
LE: loop exit
PB: predicated region body
PF: predicated region fallthrough
CT: control target
= control target key end

     0   :  { %11 = vsyncpa [#allocation5], 0  ;;  %s630_s0 = inlined_call_operand.hbm [shape: bf16[16,128], index: 0, kind: input, shape index: {}]   ;;  %s631_s1 = inlined_call_operand.hbm [shape: bf16[128,128], index: 1, kind: input, shape index: {}]   ;;  %s632_s2 = inlined_call_operand.hbm [shape: bf16[128,128], index: 2, kind: input, shape index: {}]   ;;  %s633_s3 = inlined_call_operand.vmem [shape: f32[1,128], index: 3, kind: input, shape index: {}]   ;;  %s634_s4 = inlined_call_operand.<no memory space> [shape: f32[1], index: 4, kind: input, shape index: {}]   ;;  %s635_s5 = inlined_call_operand.hbm [shape: f32[16,128], index: 5, kind: output, shape index: {}]  }
   0x1   :  { %12 = vsyncpa [#allocation8], 0 }
   0x2   :  { %13 = vsyncpa [#allocation6], 0  ;;  %s572_s18 = smov [#allocation7]   ;;  %s573_s20 = smov [#allocation4]  }
   0x3   :  { %s31_s19 = sshll.u32 %s572_s18, 4  ;;  %s19_s21 = sshll.u32 %s573_s20, 4  ;;  %s32_s19 = int_to_ptr.vmem [resolvable:$true] %s31_s19  ;;  %s20_s21 = int_to_ptr.vmem [resolvable:$true] %s19_s21 }
   0x4   :  { %s494_s22 = scalar_lea.vmem %s32_s19, 1024  ;;  %p499_p1 = scmp.lt.s32.totalorder %s32_s19, %s32_s19 }
   0x5   :  { %p495_p0 = scmp.ne.s32.totalorder %s32_s19, %s494_s22  ;;  %p500_p2 = scmp.lt.s32.totalorder %s494_s22, %s494_s22 }
   0x7   :  { %p501_p3 = por %p500_p2, %p499_p1 }
   0x9   :  { %p502_p4 = pnand %p501_p3, %p495_p0 }
   0xb   :  { %505 = shalt.err (!%p502_p4)
}
   0xc   :  { %s574_s23 = smov 64   ;;  %s575_s24 = smov 4  }
   0xd   :  { %37 = dma.hbm_to_vmem [thread:$0]  %s631_s1, 1024, %s32_s19, [#allocation8], %s574_s23, %s574_s23, %s575_s24  }
   0xe   :  { %s514_s27 = scalar_lea.vmem %s20_s21, 128  ;;  %p519_p6 = scmp.lt.s32.totalorder %s20_s21, %s20_s21 }
   0xf   :  { %p515_p5 = scmp.ne.s32.totalorder %s20_s21, %s514_s27  ;;  %p520_p7 = scmp.lt.s32.totalorder %s514_s27, %s514_s27 }
  0x11   :  { %p521_p8 = por %p520_p7, %p519_p6 }
  0x13   :  { %p522_p9 = pnand %p521_p8, %p515_p5 }
  0x15   :  { %525 = shalt.err (!%p522_p9)
}
  0x16   :  { %25 = dma.hbm_to_vmem [thread:$0]  %s630_s0, 128, %s20_s21, [#allocation5], %s574_s23, %s574_s23, %s575_s24  }
  0x17   :  { %s576_s30 = smov [#allocation9]  }
  0x18   :  { %s43_s6 = sshll.u32 %s576_s30, 4  ;;  %s44_s6 = int_to_ptr.vmem [resolvable:$true] %s43_s6 }
  0x19   :  { %s534_s7 = scalar_lea.vmem %s44_s6, 1024  ;;  %p539_p11 = scmp.lt.s32.totalorder %s44_s6, %s44_s6 }
  0x1a   :  { %p535_p10 = scmp.ne.s32.totalorder %s44_s6, %s534_s7  ;;  %p540_p12 = scmp.lt.s32.totalorder %s534_s7, %s534_s7 }
  0x1c   :  { %p541_p13 = por %p540_p12, %p539_p11 }
  0x1e   :  { %p542_p0 = pnand %p541_p13, %p535_p10 }
  0x20   :  { %545 = shalt.err (!%p542_p0)
}
  0x21   :  { %49 = dma.hbm_to_vmem [thread:$0]  %s632_s2, 1024, %s44_s6, [#allocation8], %s574_s23, %s574_s23, %s575_s24  }
  0x22   :  { %566 = dma.done.wait [#allocation5], 128  }
  0x23   :  { %567 = vsyncadd [#allocation5], 4294967168 }
  0x24   :  { %568 = dma.done.wait [#allocation8], 2048  }
  0x25   :  { %569 = vsyncadd [#allocation8], 4294965248  ;;  %v577_v0 = vmov 0.0   ;;  %vm578_vm0 = vmmov 0   ;;  %v477_v1 = vld [vmem:[#allocation7 + $0x38] sm:$0xff]   ;;  %v478_v2 = vld [vmem:[#allocation7 + $0x30] sm:$0xff]   ;;  %v311_v40 = vstv %s634_s4 }
  0x26   :  { %412 = vmatprep.subr.bf16.mxu0 %v577_v0  ;;  %428 = vmatprep.mubr.msk.bf16.mxu0 %vm578_vm0, %v577_v0  ;;  %v479_v3 = vld [vmem:[#allocation7 + $0x28] sm:$0xff]   ;;  %v384_v4 = vld [vmem:[#allocation9 + $0x38] sm:$0xff]   ;;  %v383_v5 = vld [vmem:[#allocation9 + $0x30] sm:$0xff]   ;;  %s579_s11 = smov [#allocation10]  }
  0x27   :  { %413 = vmatpush3.bf16.msra.mxu0 %v477_v1  ;;  %v480_v6 = vld [vmem:[#allocation7 + $0x20] sm:$0xff]   ;;  %v376_v7 = vunpack.c.l.bf16 %v384_v4  ;;  %v377_v8 = vunpack.c.h.bf16 %v384_v4  ;;  %v373_v9 = vunpack.c.h.bf16 %v383_v5  ;;  %v382_v10 = vld [vmem:[#allocation9 + $0x28] sm:$0xff]   ;;  %v481_v11 = vld [vmem:[#allocation7 + $0x18] sm:$0xff]   ;;  %v372_v12 = vunpack.c.l.bf16 %v383_v5  ;;  %s323_s12 = sshll.u32 %s579_s11, 4  ;;  %s324_s12 = int_to_ptr.vmem [resolvable:$true] %s323_s12 }
  0x28   :  { %414 = vmatprep.subr.bf16.mxu0 %v577_v0  ;;  %v369_v13 = vunpack.c.h.bf16 %v382_v10  ;;  %v381_v14 = vld [vmem:[#allocation9 + $0x20] sm:$0xff]   ;;  %v482_v15 = vld [vmem:[#allocation7 + $0x10] sm:$0xff]   ;;  %v368_v16 = vunpack.c.l.bf16 %v382_v10  ;;  %v380_v18 = vld [vmem:[#allocation9 + $0x18] sm:$0xff]   ;;  %p551_p2 = scmp.lt.s32.totalorder %s324_s12, %s324_s12 }
  0x29   :  { %432 = vmatprep.subr.mxu1 %v377_v8  ;;  %v365_v17 = vunpack.c.h.bf16 %v381_v14  ;;  %v483_v19 = vld [vmem:[#allocation7 + $0x8] sm:$0xff]   ;;  %v364_v20 = vunpack.c.l.bf16 %v381_v14  ;;  %v361_v21 = vunpack.c.h.bf16 %v380_v18  ;;  %v379_v22 = vld [vmem:[#allocation9 + $0x10] sm:$0xff]   ;;  %v484_v23 = vld [vmem:[#allocation7] sm:$0xff]   ;;  %v360_v24 = vunpack.c.l.bf16 %v380_v18 }
  0x2a   :  { %433 = vmatpush3.msra.mxu1 %v377_v8  ;;  %v357_v25 = vunpack.c.h.bf16 %v379_v22  ;;  %v485_v26 = vld [vmem:[#allocation4] sm:$0xff]   ;;  %v378_v27 = vld [vmem:[#allocation9 + $0x8] sm:$0xff]   ;;  %v356_v28 = vunpack.c.l.bf16 %v379_v22  ;;  %v347_v31 = vld [vmem:[#allocation9] sm:$0xff]  }
  0x2b   :  { %415 = vmatpush3.bf16.msra.mxu0 %v478_v2  ;;  %434 = vmatprep.subr.mxu1 %v376_v7  ;;  %v353_v29 = vunpack.c.h.bf16 %v378_v27  ;;  %v352_v30 = vunpack.c.l.bf16 %v378_v27  ;;  %v349_v32 = vunpack.c.h.bf16 %v347_v31  ;;  %v348_v33 = vunpack.c.l.bf16 %v347_v31  ;;  %v345_v38 = vld [vmem:[%s633_s3] ss:$0 sm:$0xff]  ;;  %s546_s3 = scalar_lea.vmem %s324_s12, 256 }
  0x2c   :  { %416 = vmatprep.subr.bf16.mxu0 %v577_v0  ;;  %435 = vmatpush3.msra.mxu1 %v376_v7  ;;  %p547_p1 = scmp.ne.s32.totalorder %s324_s12, %s546_s3  ;;  %p552_p3 = scmp.lt.s32.totalorder %s546_s3, %s546_s3 }
  0x2d   :  { %436 = vmatprep.subr.mxu1 %v373_v9 }
  0x2e   :  { %437 = vmatpush3.msra.mxu1 %v373_v9  ;;  %p553_p4 = por %p552_p3, %p551_p2 }
  0x2f   :  { %417 = vmatpush3.bf16.msra.mxu0 %v479_v3  ;;  %438 = vmatprep.subr.mxu1 %v372_v12 }
  0x30   :  { %418 = vmatprep.subr.bf16.mxu0 %v577_v0  ;;  %439 = vmatpush3.msra.mxu1 %v372_v12  ;;  %p554_p5 = pnand %p553_p4, %p547_p1 }
  0x31   :  { %440 = vmatprep.subr.mxu1 %v369_v13 }
  0x32   :  { %441 = vmatpush3.msra.mxu1 %v369_v13 }
  0x33   :  { %419 = vmatpush3.bf16.msra.mxu0 %v480_v6  ;;  %442 = vmatprep.subr.mxu1 %v368_v16 }
  0x34   :  { %420 = vmatprep.subr.bf16.mxu0 %v577_v0  ;;  %443 = vmatpush3.msra.mxu1 %v368_v16 }
  0x35   :  { %444 = vmatprep.subr.mxu1 %v365_v17 }
  0x36   :  { %445 = vmatpush3.msra.mxu1 %v365_v17 }
  0x37   :  { %421 = vmatpush3.bf16.msra.mxu0 %v481_v11  ;;  %446 = vmatprep.subr.mxu1 %v364_v20 }
  0x38   :  { %422 = vmatprep.subr.bf16.mxu0 %v577_v0  ;;  %447 = vmatpush3.msra.mxu1 %v364_v20 }
  0x39   :  { %448 = vmatprep.subr.mxu1 %v361_v21 }
  0x3a   :  { %449 = vmatpush3.msra.mxu1 %v361_v21 }
  0x3b   :  { %423 = vmatpush3.bf16.msra.mxu0 %v482_v15  ;;  %450 = vmatprep.subr.mxu1 %v360_v24 }
  0x3c   :  { %424 = vmatprep.subr.bf16.mxu0 %v577_v0  ;;  %451 = vmatpush3.msra.mxu1 %v360_v24 }
  0x3d   :  { %452 = vmatprep.subr.mxu1 %v357_v25 }
  0x3e   :  { %453 = vmatpush3.msra.mxu1 %v357_v25 }
  0x3f   :  { %425 = vmatpush3.bf16.msra.mxu0 %v483_v19  ;;  %454 = vmatprep.subr.mxu1 %v356_v28 }
  0x40   :  { %426 = vmatprep.subr.bf16.mxu0 %v577_v0  ;;  %455 = vmatpush3.msra.mxu1 %v356_v28 }
  0x41   :  { %456 = vmatprep.subr.mxu1 %v353_v29 }
  0x42   :  { %457 = vmatpush3.msra.mxu1 %v353_v29 }
  0x43   :  { %427 = vmatpush3.bf16.msra.mxu0 %v484_v23  ;;  %458 = vmatprep.subr.mxu1 %v352_v30 }
  0x44   :  { %459 = vmatpush3.msra.mxu1 %v352_v30 }
  0x45   :  { %460 = vmatprep.subr.mxu1 %v349_v32 }
  0x46   :  { %429 = vmatmul.mubr.bf16.vlgmr.msra.gmra.mxu0 %v485_v26  ;;  %461 = vmatpush3.msra.mxu1 %v349_v32 }
  0x47   :  { %462 = vmatprep.subr.mxu1 %v348_v33 }
  0x48   :  { %463 = vmatpush3.msra.mxu1 %v348_v33 }
 0x106   :  { %v178_v34 = vpop.f32.mrf.mxu0 }
 0x107   :  { %464 = vmatprep.mubr.f32.mxu1 %v178_v34 }
 0x108   :  { %v430_v35 = vpop.f32.mrf.mxu0 }
 0x10a   :  { %v181_v36 = vpop.f32.mrf.mxu0 }
 0x10b   :  { %465 = vmatmul.mubr.f32.vlgmr.msra.gmra.mxu1 %v181_v36 }
 0x10c   :  { %v431_v37 = vpop.f32.mrf.mxu0 }
 0x1cb   :  { %v466_v39 = vpop.f32.mrf.mxu1 }
 0x1cc   :  { %v305_v41 = vadd.f32 %v466_v39, %v345_v38 }
 0x1cd   :  { %v299_v42 = vpop.f32.mrf.mxu1 }
 0x1ce   :  { %vm310_vm1 = vcmp.ge.f32.partialorder %v305_v41, 0.0  ;;  %v313_v43 = vmul.f32 %v311_v40, %v305_v41  ;;  %v300_v44 = vadd.f32 %v345_v38, %v299_v42 }
 0x1d0   :  { %v315_v45 = vsel %vm310_vm1, %v305_v41, %v313_v43  ;;  %vm309_vm2 = vcmp.ge.f32.partialorder %v300_v44, 0.0  ;;  %v312_v46 = vmul.f32 %v311_v40, %v300_v44 }
 0x1d1   :  { %317 = vst [vmem:[#allocation10 + $0x8] sm:$0xff] %v315_v45 }
 0x1d2   :  { %v314_v47 = vsel %vm309_vm2, %v300_v44, %v312_v46 }
 0x1d3   :  { %316 = vst [vmem:[#allocation10] sm:$0xff] %v314_v47 }
 0x1d4   :  { %557 = shalt.err (!%p554_p5)
}
 0x1d5   :  { %s580_s4 = smov 128   ;;  %s581_s13 = smov 8  }
 0x1d6   :  { %329 = dma.vmem_to_hbm [thread:$0]  %s324_s12, 256, %s635_s5, [#allocation6], %s580_s4, %s580_s4, %s581_s13  }
 0x1d7   :  { %570 = dma.done.wait [#allocation6], 256  }
 0x1d8   :  { %571 = vsyncadd [#allocation6], 4294967040 }
 0x1d9   :  { %333 = vsyncpa [#allocation5], 1 }
 0x1da   :  { %334 = vsyncpa [#allocation8], 1 }
 0x1db   :  { %335 = vsyncpa [#allocation6], 1 }

</bundles_post_ra>
